<compile_context>
chip_gen: v6e
topology: v6e:2x2x1
jax: 0.10.0
libtpu: 0.0.40
codegen_flags: <defaults>
</compile_context>

<pallas_src>
import functools

import jax
import jax.numpy as jnp
from jax.experimental import pallas as pl
from jax.experimental.pallas import tpu as pltpu

LANE = 128
MIN_TILE_ROWS = 16  # sublane-safe for both f32 (8) and bf16 (16) packing


def _round_up(x, m):
    return (x + m - 1) // m * m


def mlp_kernel(x_ref, w1_ref, b1_ref, w2_ref, b2_ref, o_ref):
    # fc1: (tb, 256) @ (256, 128) -> f32 accumulation on the MXU
    h = jnp.dot(x_ref[...], w1_ref[...], preferred_element_type=jnp.float32)
    # bias + ReLU in f32 (VPU)
    h = jnp.maximum(h + b1_ref[...], 0.0)
    # fc2: downcast h to the compute dtype (bf16 fast path) for the MXU,
    # accumulate in f32.
    y = jnp.dot(h.astype(w2_ref.dtype), w2_ref[...],
                preferred_element_type=jnp.float32)
    o_ref[...] = (y + b2_ref[...]).astype(o_ref.dtype)


def preprocess_params(w1, b1, w2, b2, compute_dtype=jnp.bfloat16):
    """One-time preprocessing of PyTorch-layout params.

    w1: (100, 256), b1: (100,), w2: (d_out, 100), b2: (d_out,) [nn.Linear layout]
    Returns (w1_t, b1_2d, w2_t, b2_2d): transposed / lane-padded / casted arrays.
    """
    d_hid, d_in = w1.shape
    d_out = w2.shape[0]
    d_hid_p = _round_up(d_hid, LANE)   # 100 -> 128
    d_out_p = _round_up(d_out, LANE)   # e.g. 10 -> 128

    w1_t = jnp.zeros((d_in, d_hid_p), compute_dtype)
    w1_t = w1_t.at[:, :d_hid].set(jnp.transpose(w1).astype(compute_dtype))
    b1_p = jnp.zeros((1, d_hid_p), jnp.float32)
    b1_p = b1_p.at[0, :d_hid].set(b1.astype(jnp.float32))

    w2_t = jnp.zeros((d_hid_p, d_out_p), compute_dtype)
    w2_t = w2_t.at[:d_hid, :d_out].set(jnp.transpose(w2).astype(compute_dtype))
    b2_p = jnp.zeros((1, d_out_p), jnp.float32)
    b2_p = b2_p.at[0, :d_out].set(b2.astype(jnp.float32))

    return w1_t, b1_p, w2_t, b2_p


@functools.partial(jax.jit, static_argnames=("d_out", "tile_b"))
def network3_forward(x, w1_t, b1_2d, w2_t, b2_2d, *, d_out, tile_b=512):
    """x: (B, 256). Preprocessed params as arrays. Returns (B, d_out) in x.dtype."""
    B, d_in = x.shape
    assert w1_t.shape[0] == d_in, "w1_t must be (d_in, d_hid_p)"
    d_hid_p = w1_t.shape[1]
    d_out_p = w2_t.shape[1]
    compute_dtype = w1_t.dtype
    out_dtype = x.dtype

    # Effective row tile: big for large B, shrunk (but sublane-aligned) for
    # small B so tiny batches don't pay for a 512-row matmul.
    tb = min(tile_b, _round_up(B, MIN_TILE_ROWS))
    tb = _round_up(tb, MIN_TILE_ROWS)
    b_pad = _round_up(B, tb)

    x_c = x.astype(compute_dtype)
    if b_pad != B:
        x_c = jnp.zeros((b_pad, d_in), compute_dtype).at[:B].set(x_c)

    grid = (b_pad // tb,)

    itemsize_c = jnp.dtype(compute_dtype).itemsize
    flops = 2 * b_pad * (d_in * d_hid_p + d_hid_p * d_out_p)
    bytes_accessed = (
        b_pad * d_in * itemsize_c                                   # x
        + (d_in * d_hid_p + d_hid_p * d_out_p) * itemsize_c         # weights
        + (d_hid_p + d_out_p) * 4                                   # biases (f32)
        + b_pad * d_out_p * jnp.dtype(out_dtype).itemsize           # output
    )

    out_padded = pl.pallas_call(
        mlp_kernel,
        out_shape=jax.ShapeDtypeStruct((b_pad, d_out_p), out_dtype),
        grid_spec=pltpu.PrefetchScalarGridSpec(
            num_scalar_prefetch=0,
            grid=grid,
            in_specs=[
                pl.BlockSpec((tb, d_in), lambda i: (i, 0)),         # x tile
                pl.BlockSpec((d_in, d_hid_p), lambda i: (0, 0)),    # W1^T (resident)
                pl.BlockSpec((1, d_hid_p), lambda i: (0, 0)),       # b1
                pl.BlockSpec((d_hid_p, d_out_p), lambda i: (0, 0)), # W2^T (resident)
                pl.BlockSpec((1, d_out_p), lambda i: (0, 0)),       # b2
            ],
            out_specs=pl.BlockSpec((tb, d_out_p), lambda i: (i, 0)),
        ),
        compiler_params=pltpu.CompilerParams(
            dimension_semantics=("parallel",)),
        cost_estimate=pl.CostEstimate(
            flops=int(flops), transcendentals=0,
            bytes_accessed=int(bytes_accessed)),
    )(x_c, w1_t, b1_2d, w2_t, b2_2d)

    # Slice padded rows / lanes back off.
    return out_padded[:B, :d_out]


def network3_reference(x, w1, b1, w2, b2):
    h = jnp.maximum(x @ w1.T + b1, 0.0)
    return h @ w2.T + b2


if __name__ == "__main__":
    key = jax.random.PRNGKey(0)
    k_x, k_w1, k_b1, k_w2, k_b2 = jax.random.split(key, 5)

    in_features = 256
    hidden = 100
    out_features = 10

    # PyTorch nn.Linear weight layout: (out_features, in_features)
    w1 = jax.random.normal(k_w1, (hidden, in_features), dtype=jnp.float32) * 0.05
    b1 = jax.random.normal(k_b1, (hidden,), dtype=jnp.float32) * 0.05
    w2 = jax.random.normal(k_w2, (out_features, hidden), dtype=jnp.float32) * 0.05
    b2 = jax.random.normal(k_b2, (out_features,), dtype=jnp.float32) * 0.05

    # --- exact-precision path (f32 compute) --------------------------------
    x_f32 = jax.random.normal(k_x, (8, in_features), dtype=jnp.float32)
    p_f32 = preprocess_params(w1, b1, w2, b2, compute_dtype=jnp.float32)
    out_f32 = jax.block_until_ready(
        network3_forward(x_f32, *p_f32, d_out=out_features))
    ref_f32 = network3_reference(x_f32, w1, b1, w2, b2)
    assert out_f32.shape == (8, out_features)
    assert jnp.allclose(out_f32, ref_f32, atol=1e-4, rtol=1e-4), "f32 mismatch"

    # --- fast path (bf16 operands, f32 accumulation), ragged batch ---------
    x_odd = jax.random.normal(k_x, (10, in_features), dtype=jnp.float32)
    p_bf16 = preprocess_params(w1, b1, w2, b2, compute_dtype=jnp.bfloat16)
    out_bf16 = jax.block_until_ready(
        network3_forward(x_odd, *p_bf16, d_out=out_features))
    ref_odd = network3_reference(x_odd, w1, b1, w2, b2)
    assert out_bf16.shape == (10, out_features)
    assert jnp.allclose(out_bf16, ref_odd, atol=3e-2, rtol=3e-2), "bf16 mismatch"

    print("KERNEL_OK")
</pallas_src>

<mosaic_0001>
module attributes {stable_mosaic.version = 11 : i64} {
  func.func @mlp_kernel(%arg0: i32, %arg1: memref<16x256xf32, #tpu.memory_space<vmem>>, %arg2: memref<256x128xf32, #tpu.memory_space<vmem>>, %arg3: memref<1x128xf32, #tpu.memory_space<vmem>>, %arg4: memref<128x128xf32, #tpu.memory_space<vmem>>, %arg5: memref<1x128xf32, #tpu.memory_space<vmem>>, %arg6: memref<16x128xf32, #tpu.memory_space<vmem>>) attributes {dimension_semantics = [#tpu.dimension_semantics<parallel>], iteration_bounds = array<i64: 1>, scalar_prefetch = 0 : i64, scratch_operands = 0 : i64, tpu.core_type = #tpu.core_type<tc>, window_params = [{transform_indices = @transform_0, window_bounds = array<i64: 16, 256>}, {pipeline_mode = #tpu.pipeline_mode<synchronous>, transform_indices = @transform_1, window_bounds = array<i64: 256, 128>}, {pipeline_mode = #tpu.pipeline_mode<synchronous>, transform_indices = @transform_2, window_bounds = array<i64: 1, 128>}, {pipeline_mode = #tpu.pipeline_mode<synchronous>, transform_indices = @transform_3, window_bounds = array<i64: 128, 128>}, {pipeline_mode = #tpu.pipeline_mode<synchronous>, transform_indices = @transform_4, window_bounds = array<i64: 1, 128>}, {transform_indices = @transform_5, window_bounds = array<i64: 16, 128>}]} {
    %c0 = arith.constant 0 : index
    %c0_0 = arith.constant 0 : index
    %0 = vector.load %arg1[%c0, %c0_0] : memref<16x256xf32, #tpu.memory_space<vmem>>, vector<16x256xf32>
    %c0_1 = arith.constant 0 : index
    %c0_2 = arith.constant 0 : index
    %1 = vector.load %arg2[%c0_1, %c0_2] : memref<256x128xf32, #tpu.memory_space<vmem>>, vector<256x128xf32>
    %cst = arith.constant dense<0.000000e+00> : vector<16x128xf32>
    %2 = tpu.matmul %0, %1, %cst {dimension_numbers = #tpu.dot_dimension_numbers<[1], [0], [0], [1], [0, 0, 1, 1], [], []>} : vector<16x256xf32>, vector<256x128xf32>, vector<16x128xf32> -> vector<16x128xf32>
    %c0_3 = arith.constant 0 : index
    %c0_4 = arith.constant 0 : index
    %3 = vector.load %arg3[%c0_3, %c0_4] : memref<1x128xf32, #tpu.memory_space<vmem>>, vector<1x128xf32>
    %4 = vector.broadcast %3 : vector<1x128xf32> to vector<16x128xf32>
    %5 = arith.addf %2, %4 : vector<16x128xf32>
    %cst_5 = arith.constant 0.000000e+00 : f32
    %6 = vector.broadcast %cst_5 : f32 to vector<16x128xf32>
    %7 = arith.maximumf %5, %6 : vector<16x128xf32>
    %c0_6 = arith.constant 0 : index
    %c0_7 = arith.constant 0 : index
    %8 = vector.load %arg4[%c0_6, %c0_7] : memref<128x128xf32, #tpu.memory_space<vmem>>, vector<128x128xf32>
    %cst_8 = arith.constant dense<0.000000e+00> : vector<16x128xf32>
    %9 = tpu.matmul %7, %8, %cst_8 {dimension_numbers = #tpu.dot_dimension_numbers<[1], [0], [0], [1], [0, 0, 1, 1], [], []>} : vector<16x128xf32>, vector<128x128xf32>, vector<16x128xf32> -> vector<16x128xf32>
    %c0_9 = arith.constant 0 : index
    %c0_10 = arith.constant 0 : index
    %10 = vector.load %arg5[%c0_9, %c0_10] : memref<1x128xf32, #tpu.memory_space<vmem>>, vector<1x128xf32>
    %11 = vector.broadcast %10 : vector<1x128xf32> to vector<16x128xf32>
    %12 = arith.addf %9, %11 : vector<16x128xf32>
    %c0_11 = arith.constant 0 : index
    %c0_12 = arith.constant 0 : index
    %13 = vector.load %arg6[%c0_11, %c0_12] : memref<16x128xf32, #tpu.memory_space<vmem>>, vector<16x128xf32>
    tpu.vector_store %arg6[%c0_11, %c0_12], %12 {strides = array<i32>} : memref<16x128xf32, #tpu.memory_space<vmem>>, vector<16x128xf32>,
    return
  }
  func.func @transform_0(%arg0: i32) -> (i32, i32) {
    %c0_i32 = arith.constant 0 : i32
    %c0_i32_0 = arith.constant 0 : i32
    return %arg0, %c0_i32 : i32, i32
  }
  func.func @transform_1(%arg0: i32) -> (i32, i32) {
    %c0_i32 = arith.constant 0 : i32
    %c0_i32_0 = arith.constant 0 : i32
    %c0_i32_1 = arith.constant 0 : i32
    return %c0_i32, %c0_i32_0 : i32, i32
  }
  func.func @transform_2(%arg0: i32) -> (i32, i32) {
    %c0_i32 = arith.constant 0 : i32
    %c0_i32_0 = arith.constant 0 : i32
    %c0_i32_1 = arith.constant 0 : i32
    return %c0_i32, %c0_i32_0 : i32, i32
  }
  func.func @transform_3(%arg0: i32) -> (i32, i32) {
    %c0_i32 = arith.constant 0 : i32
    %c0_i32_0 = arith.constant 0 : i32
    %c0_i32_1 = arith.constant 0 : i32
    return %c0_i32, %c0_i32_0 : i32, i32
  }
  func.func @transform_4(%arg0: i32) -> (i32, i32) {
    %c0_i32 = arith.constant 0 : i32
    %c0_i32_0 = arith.constant 0 : i32
    %c0_i32_1 = arith.constant 0 : i32
    return %c0_i32, %c0_i32_0 : i32, i32
  }
  func.func @transform_5(%arg0: i32) -> (i32, i32) {
    %c0_i32 = arith.constant 0 : i32
    %c0_i32_0 = arith.constant 0 : i32
    return %arg0, %c0_i32 : i32, i32
  }
}

</mosaic_0001>

<bundles_post_ra>
// kernel: network3_forward.1
= control target key start
LH: loop header
LB: loop body
LE: loop exit
PB: predicated region body
PF: predicated region fallthrough
CT: control target
= control target key end

     0   :  { %10 = vsyncpa [#allocation3], 0  ;;  %s479_s0 = inlined_call_operand.vmem [shape: f32[16,256], index: 0, kind: input, shape index: {}]   ;;  %s480_s1 = inlined_call_operand.hbm [shape: f32[256,128], index: 1, kind: input, shape index: {}]   ;;  %s481_s2 = inlined_call_operand.vmem [shape: f32[1,128], index: 2, kind: input, shape index: {}]   ;;  %s482_s3 = inlined_call_operand.hbm [shape: f32[128,128], index: 3, kind: input, shape index: {}]   ;;  %s483_s4 = inlined_call_operand.vmem [shape: f32[1,128], index: 4, kind: input, shape index: {}]   ;;  %s484_s5 = inlined_call_operand.vmem [shape: f32[16,128], index: 5, kind: output, shape index: {}]  }
   0x1   :  { %11 = vsyncpa [#allocation5], 0  ;;  %s415_s18 = smov [#allocation2]  }
   0x2   :  { %s19_s19 = sshll.u32 %s415_s18, 4  ;;  %s20_s19 = int_to_ptr.vmem [resolvable:$true] %s19_s19 }
   0x3   :  { %s379_s20 = scalar_lea.vmem %s20_s19, 4096  ;;  %p384_p1 = scmp.lt.s32.totalorder %s20_s19, %s20_s19 }
   0x4   :  { %p380_p0 = scmp.ne.s32.totalorder %s20_s19, %s379_s20  ;;  %p385_p2 = scmp.lt.s32.totalorder %s379_s20, %s379_s20 }
   0x6   :  { %p386_p3 = por %p385_p2, %p384_p1 }
   0x8   :  { %p387_p4 = pnand %p386_p3, %p380_p0 }
   0xa   :  { %390 = shalt.err (!%p387_p4)
}
   0xb   :  { %s416_s21 = smov 128   ;;  %s417_s22 = smov 8  }
   0xc   :  { %25 = dma.hbm_to_vmem [thread:$0]  %s480_s1, 4096, %s20_s19, [#allocation3], %s416_s21, %s416_s21, %s417_s22  }
   0xd   :  { %s418_s25 = smov [#allocation4]  }
   0xe   :  { %s33_s26 = sshll.u32 %s418_s25, 4  ;;  %s34_s26 = int_to_ptr.vmem [resolvable:$true] %s33_s26 }
   0xf   :  { %s399_s27 = scalar_lea.vmem %s34_s26, 2048  ;;  %p404_p6 = scmp.lt.s32.totalorder %s34_s26, %s34_s26 }
  0x10   :  { %p400_p5 = scmp.ne.s32.totalorder %s34_s26, %s399_s27  ;;  %p405_p7 = scmp.lt.s32.totalorder %s399_s27, %s399_s27 }
  0x12   :  { %p406_p8 = por %p405_p7, %p404_p6 }
  0x14   :  { %p407_p9 = pnand %p406_p8, %p400_p5 }
  0x16   :  { %410 = shalt.err (!%p407_p9)
}
  0x17   :  { %39 = dma.hbm_to_vmem [thread:$0]  %s482_s3, 2048, %s34_s26, [#allocation5], %s416_s21, %s416_s21, %s417_s22  }
  0x18   :  { %411 = dma.done.wait [#allocation3], 4096  }
  0x19   :  { %412 = vsyncadd [#allocation3], 4294963200 }
  0x1a   :  { %413 = dma.done.wait [#allocation5], 2048  }
  0x1b   :  { %414 = vsyncadd [#allocation5], 4294965248  ;;  %v83_v0 = vld [vmem:[#allocation2 + $0xf8] sm:$0xff]  ;;  %v82_v2 = vld [vmem:[#allocation2 + $0xf0] sm:$0xff] }
  0x1c   :  { %v67_v1 = vld [vmem:[#allocation2 + $0x78] sm:$0xff]  ;;  %276 = vmatprep.subr.mxu0 %v83_v0  ;;  %v66_v3 = vld [vmem:[#allocation2 + $0x70] sm:$0xff]  ;;  %v81_v4 = vld [vmem:[#allocation2 + $0xe8] sm:$0xff] }
  0x1d   :  { %277 = vmatpush3.msra.mxu0 %v67_v1  ;;  %v65_v5 = vld [vmem:[#allocation2 + $0x68] sm:$0xff]  ;;  %v80_v6 = vld [vmem:[#allocation2 + $0xe0] sm:$0xff]  ;;  %v79_v8 = vld [vmem:[#allocation2 + $0xd8] sm:$0xff] }
  0x1e   :  { %278 = vmatprep.subr.mxu0 %v82_v2  ;;  %v64_v7 = vld [vmem:[#allocation2 + $0x60] sm:$0xff]  ;;  %v63_v9 = vld [vmem:[#allocation2 + $0x58] sm:$0xff]  ;;  %v78_v10 = vld [vmem:[#allocation2 + $0xd0] sm:$0xff] }
  0x1f   :  { %279 = vmatpush3.msra.mxu0 %v66_v3  ;;  %v62_v11 = vld [vmem:[#allocation2 + $0x50] sm:$0xff]  ;;  %v77_v12 = vld [vmem:[#allocation2 + $0xc8] sm:$0xff]  ;;  %v76_v15 = vld [vmem:[#allocation2 + $0xc0] sm:$0xff] }
  0x20   :  { %280 = vmatprep.subr.mxu0 %v81_v4  ;;  %v49_v13 = vld [vmem:[%s479_s0 + $0x8] sm:$0xff]  ;;  %v183_v16 = vld [vmem:[#allocation4 + $0x78] sm:$0xff]  ;;  %v182_v17 = vld [vmem:[#allocation4 + $0x70] sm:$0xff] }
  0x21   :  { %281 = vmatpush3.msra.mxu0 %v65_v5  ;;  %v61_v14 = vld [vmem:[#allocation2 + $0x48] sm:$0xff]  ;;  %155 = vmatprep.mubr.f32.mxu0 %v49_v13  ;;  %v60_v18 = vld [vmem:[#allocation2 + $0x40] sm:$0xff]  ;;  %v75_v19 = vld [vmem:[#allocation2 + $0xb8] sm:$0xff] }
  0x22   :  { %282 = vmatprep.subr.mxu0 %v80_v6  ;;  %332 = vmatprep.subr.mxu1 %v183_v16  ;;  %v181_v20 = vld [vmem:[#allocation4 + $0x68] sm:$0xff]  ;;  %v59_v21 = vld [vmem:[#allocation2 + $0x38] sm:$0xff]  ;;  %v74_v22 = vld [vmem:[#allocation2 + $0xb0] sm:$0xff] }
  0x23   :  { %283 = vmatpush3.msra.mxu0 %v64_v7  ;;  %333 = vmatpush3.msra.mxu1 %v183_v16  ;;  %v180_v23 = vld [vmem:[#allocation4 + $0x60] sm:$0xff]  ;;  %v58_v24 = vld [vmem:[#allocation2 + $0x30] sm:$0xff]  ;;  %v73_v25 = vld [vmem:[#allocation2 + $0xa8] sm:$0xff] }
  0x24   :  { %284 = vmatprep.subr.mxu0 %v79_v8  ;;  %334 = vmatprep.subr.mxu1 %v182_v17  ;;  %v179_v26 = vld [vmem:[#allocation4 + $0x58] sm:$0xff]  ;;  %v57_v27 = vld [vmem:[#allocation2 + $0x28] sm:$0xff]  ;;  %v72_v28 = vld [vmem:[#allocation2 + $0xa0] sm:$0xff] }
  0x25   :  { %285 = vmatpush3.msra.mxu0 %v63_v9  ;;  %335 = vmatpush3.msra.mxu1 %v182_v17  ;;  %v178_v29 = vld [vmem:[#allocation4 + $0x50] sm:$0xff]  ;;  %v56_v30 = vld [vmem:[#allocation2 + $0x20] sm:$0xff]  ;;  %v71_v31 = vld [vmem:[#allocation2 + $0x98] sm:$0xff] }
  0x26   :  { %286 = vmatprep.subr.mxu0 %v78_v10  ;;  %336 = vmatprep.subr.mxu1 %v181_v20  ;;  %v177_v32 = vld [vmem:[#allocation4 + $0x48] sm:$0xff]  ;;  %v55_v33 = vld [vmem:[#allocation2 + $0x18] sm:$0xff]  ;;  %v70_v34 = vld [vmem:[#allocation2 + $0x90] sm:$0xff] }
  0x27   :  { %287 = vmatpush3.msra.mxu0 %v62_v11  ;;  %337 = vmatpush3.msra.mxu1 %v181_v20  ;;  %v176_v35 = vld [vmem:[#allocation4 + $0x40] sm:$0xff]  ;;  %v54_v36 = vld [vmem:[#allocation2 + $0x10] sm:$0xff]  ;;  %v69_v37 = vld [vmem:[#allocation2 + $0x88] sm:$0xff] }
  0x28   :  { %288 = vmatprep.subr.mxu0 %v77_v12  ;;  %338 = vmatprep.subr.mxu1 %v180_v23  ;;  %v175_v38 = vld [vmem:[#allocation4 + $0x38] sm:$0xff]  ;;  %v53_v39 = vld [vmem:[#allocation2 + $0x8] sm:$0xff]  ;;  %v68_v40 = vld [vmem:[#allocation2 + $0x80] sm:$0xff] }
  0x29   :  { %289 = vmatpush3.msra.mxu0 %v61_v14  ;;  %339 = vmatpush3.msra.mxu1 %v180_v23  ;;  %v174_v41 = vld [vmem:[#allocation4 + $0x30] sm:$0xff]  ;;  %v52_v42 = vld [vmem:[#allocation2] sm:$0xff]  ;;  %v51_v44 = vld [vmem:[%s479_s0 + $0x18] sm:$0xff] }
  0x2a   :  { %290 = vmatprep.subr.mxu0 %v76_v15  ;;  %340 = vmatprep.subr.mxu1 %v179_v26  ;;  %v48_v43 = vld [vmem:[%s479_s0] sm:$0xff]  ;;  %v50_v45 = vld [vmem:[%s479_s0 + $0x10] sm:$0xff]  ;;  %v173_v46 = vld [vmem:[#allocation4 + $0x28] sm:$0xff] }
  0x2b   :  { %291 = vmatpush3.msra.mxu0 %v60_v18  ;;  %341 = vmatpush3.msra.mxu1 %v179_v26  ;;  %v172_v47 = vld [vmem:[#allocation4 + $0x20] sm:$0xff]  ;;  %v171_v48 = vld [vmem:[#allocation4 + $0x18] sm:$0xff]  ;;  %v170_v49 = vld [vmem:[#allocation4 + $0x10] sm:$0xff] }
  0x2c   :  { %292 = vmatprep.subr.mxu0 %v75_v19  ;;  %342 = vmatprep.subr.mxu1 %v178_v29  ;;  %v169_v50 = vld [vmem:[#allocation4 + $0x8] sm:$0xff]  ;;  %v168_v51 = vld [vmem:[#allocation4] sm:$0xff] }
  0x2d   :  { %293 = vmatpush3.msra.mxu0 %v59_v21  ;;  %343 = vmatpush3.msra.mxu1 %v178_v29  ;;  %v274_v54 = vld [vmem:[%s481_s2] ss:$0 sm:$0xff] }
  0x2e   :  { %294 = vmatprep.subr.mxu0 %v74_v22  ;;  %344 = vmatprep.subr.mxu1 %v177_v32  ;;  %v275_v63 = vld [vmem:[%s483_s4] ss:$0 sm:$0xff] }
  0x2f   :  { %295 = vmatpush3.msra.mxu0 %v58_v24  ;;  %345 = vmatpush3.msra.mxu1 %v177_v32 }
  0x30   :  { %296 = vmatprep.subr.mxu0 %v73_v25  ;;  %346 = vmatprep.subr.mxu1 %v176_v35 }
  0x31   :  { %297 = vmatpush3.msra.mxu0 %v57_v27  ;;  %347 = vmatpush3.msra.mxu1 %v176_v35 }
  0x32   :  { %298 = vmatprep.subr.mxu0 %v72_v28  ;;  %348 = vmatprep.subr.mxu1 %v175_v38 }
  0x33   :  { %299 = vmatpush3.msra.mxu0 %v56_v30  ;;  %349 = vmatpush3.msra.mxu1 %v175_v38 }
  0x34   :  { %300 = vmatprep.subr.mxu0 %v71_v31  ;;  %350 = vmatprep.subr.mxu1 %v174_v41 }
  0x35   :  { %301 = vmatpush3.msra.mxu0 %v55_v33  ;;  %351 = vmatpush3.msra.mxu1 %v174_v41 }
  0x36   :  { %302 = vmatprep.subr.mxu0 %v70_v34  ;;  %352 = vmatprep.subr.mxu1 %v173_v46 }
  0x37   :  { %303 = vmatpush3.msra.mxu0 %v54_v36  ;;  %353 = vmatpush3.msra.mxu1 %v173_v46 }
  0x38   :  { %304 = vmatprep.subr.mxu0 %v69_v37  ;;  %354 = vmatprep.subr.mxu1 %v172_v47 }
  0x39   :  { %305 = vmatpush3.msra.mxu0 %v53_v39  ;;  %355 = vmatpush3.msra.mxu1 %v172_v47 }
  0x3a   :  { %306 = vmatprep.subr.mxu0 %v68_v40  ;;  %356 = vmatprep.subr.mxu1 %v171_v48 }
  0x3b   :  { %307 = vmatpush3.msra.mxu0 %v52_v42  ;;  %357 = vmatpush3.msra.mxu1 %v171_v48 }
  0x3c   :  { %156 = vmatmul.mubr.f32.vlgmr.msra.gmra.mxu0 %v48_v43  ;;  %358 = vmatprep.subr.mxu1 %v170_v49 }
  0x3d   :  { %160 = vmatprep.mubr.f32.mxu0 %v51_v44  ;;  %359 = vmatpush3.msra.mxu1 %v170_v49 }
  0x3e   :  { %360 = vmatprep.subr.mxu1 %v169_v50 }
  0x3f   :  { %361 = vmatpush3.msra.mxu1 %v169_v50 }
  0x40   :  { %161 = vmatmul.mubr.f32.gmra.mxu0 %v50_v45  ;;  %362 = vmatprep.subr.mxu1 %v168_v51 }
  0x41   :  { %363 = vmatpush3.msra.mxu1 %v168_v51 }
  0xfc   :  { %v308_v52 = vpop.f32.mrf.mxu0 }
  0xfe   :  { %v309_v53 = vpop.f32.mrf.mxu0 }
  0xff   :  { %v310_v55 = vadd.f32 %v309_v53, %v308_v52 }
 0x100   :  { %v311_v56 = vpop.f32.mrf.mxu0 }
 0x101   :  { %v158_v57 = vadd.f32 %v310_v55, %v274_v54 }
 0x102   :  { %v312_v58 = vpop.f32.mrf.mxu0 }
 0x103   :  { %v313_v59 = vadd.f32 %v312_v58, %v311_v56  ;;  %v166_v60 = vmax.f32 %v158_v57, 0.0 }
 0x105   :  { %v163_v61 = vadd.f32 %v313_v59, %v274_v54  ;;  %364 = vmatprep.mubr.f32.mxu1 %v166_v60 }
 0x107   :  { %v167_v62 = vmax.f32 %v163_v61, 0.0 }
 0x109   :  { %365 = vmatmul.mubr.f32.vlgmr.msra.gmra.mxu1 %v167_v62 }
 0x1c9   :  { %v366_v0 = vpop.f32.mrf.mxu1 }
 0x1ca   :  { %v263_v1 = vadd.f32 %v366_v0, %v275_v63 }
 0x1cb   :  { %v257_v2 = vpop.f32.mrf.mxu1 }
 0x1cc   :  { %267 = vst [vmem:[%s484_s5 + $0x8] sm:$0xff] %v263_v1  ;;  %v258_v3 = vadd.f32 %v275_v63, %v257_v2 }
 0x1ce   :  { %266 = vst [vmem:[%s484_s5] sm:$0xff] %v258_v3 }
 0x1cf   :  { %272 = vsyncpa [#allocation3], 1 }
 0x1d0   :  { %273 = vsyncpa [#allocation5], 1 }

</bundles_post_ra>
